<compile_context>
chip_gen: v6e
topology: v6e:2x2x1
jax: 0.10.0
libtpu: 0.0.40
codegen_flags: <defaults>
</compile_context>

<pallas_src>
import jax
import jax.numpy as jnp
from jax.experimental import pallas as pl

# ----------------------- model config (small, deterministic) -----------------
EMB_SIZE = 32
NUM_HEADS = 4
FFN_SIZE = 64
SEQ_LEN = 8
BATCH = 2
LN_EPS = 1e-5


def _layernorm(x, gamma, beta):
    # x: (T, E) f32; gamma/beta: (1, E)
    mean = jnp.mean(x, axis=-1, keepdims=True)
    var = jnp.mean((x - mean) ** 2, axis=-1, keepdims=True)
    return (x - mean) * jax.lax.rsqrt(var + LN_EPS) * gamma + beta


def _make_kernel(*, n_batch, seq, num_heads, head_dim, emb, ffn, has_mask):
    N, S, H, dh, E, F = n_batch, seq, num_heads, head_dim, emb, ffn
    T, B = N * S, H * N                      # tokens, (head, batch) attention blocks
    scale = 1.0 / (dh ** 0.5)

    def kernel(*refs):
        if has_mask:
            x_ref, wqkv_ref, wo_ref, w1_ref, w2_ref, vec_ref, mask_ref, o_ref = refs
        else:
            x_ref, wqkv_ref, wo_ref, w1_ref, w2_ref, vec_ref, o_ref = refs
            mask_ref = None

        x = x_ref[...].astype(jnp.float32)           # (T, E), batch-major tokens t = n*S + s

        # packed 1-D params: one per sublane row of an (8,128) blob, all lane-0 aligned.
        vec = vec_ref[...]
        bqkv = vec[0:1, 0:3 * E]                     # (1, 3E)
        bo = vec[1:2, 0:E]
        b1 = vec[2:3, 0:F]
        b2 = vec[3:4, 0:E]
        ln1g, ln1b = vec[4:5, 0:E], vec[5:6, 0:E]
        ln2g, ln2b = vec[6:7, 0:E], vec[7:8, 0:E]

        # ---- fused QKV projection: one lane-dense (T,E)@(E,3E) MXU matmul -----------
        # bf16 weights are promoted to f32 at the matmul; accumulation is f32.
        qkv = jnp.dot(x, wqkv_ref[...], preferred_element_type=jnp.float32) + bqkv   # (T, 3E)

        # Split heads onto a single leading batch dim b = h*N + n (cheap lane slices +
        # leading-dim concat; avoids 4-D transposes).
        def heads(col0):
            return jnp.concatenate(
                [qkv[:, col0 + h * dh: col0 + (h + 1) * dh].reshape(N, S, dh)
                 for h in range(H)], axis=0)                                          # (B, S, dh)

        q, k, v = heads(0), heads(E), heads(2 * E)

        # ---- batch-blocked attention: scores are (H*N, S, S); no cross-batch work ---
        s = jnp.einsum('bqd,bkd->bqk', q, k,
                       preferred_element_type=jnp.float32) * scale                    # (B, S, S)
        if has_mask:
            m = mask_ref[...].astype(jnp.float32)                                     # (N, S, S)
            s = s + jnp.concatenate([m] * H, axis=0)        # mask[n] for block b = h*N + n

        s = s - jnp.max(s, axis=-1, keepdims=True)
        p = jnp.exp(s)
        p = p * pl.reciprocal(jnp.sum(p, axis=-1, keepdims=True))      # exact reciprocal

        ctx = jnp.einsum('bqk,bkd->bqd', p, v,
                         preferred_element_type=jnp.float32)                          # (B, S, dh)

        # Regroup heads back onto the feature axis: blocks b = h*N + n -> (N, S, E) -> (T, E).
        ctx2 = jnp.concatenate(
            [ctx[h * N:(h + 1) * N] for h in range(H)], axis=-1).reshape(T, E)

        # ---- output projection: ONE (T,E)@(E,E); head reduction in the MXU contraction
        attn_out = jnp.dot(ctx2, wo_ref[...], preferred_element_type=jnp.float32) + bo

        # ---- residual + LayerNorm ----------------------------------------------------
        y = _layernorm(attn_out + x, ln1g, ln1b)

        # ---- pointwise FFN (Linear -> ReLU -> Linear); dropout = identity (eval) ------
        h1 = jnp.maximum(
            jnp.dot(y, w1_ref[...], preferred_element_type=jnp.float32) + b1, 0.0)
        ffn_out = jnp.dot(h1, w2_ref[...], preferred_element_type=jnp.float32) + b2

        # ---- residual + LayerNorm ----------------------------------------------------
        o_ref[...] = _layernorm(ffn_out + y, ln2g, ln2b).astype(o_ref.dtype)

    return kernel


@jax.jit
def transformer_encoder_layer(source, attn_mask, packed_params):
    """source: [S, N, E] (batch_first=False). attn_mask: None | [S,S] | [1,S,S] | [N,S,S] additive."""
    S, N, E = source.shape
    H = NUM_HEADS
    dh = E // H
    w_qkv, wo, w1, w2, vecs = packed_params
    F = w1.shape[1]
    T = N * S

    # Batch-major token layout (t = n*S + s): attention blocks are contiguous, so the
    # kernel never computes cross-batch scores.  [S,N,E] -> [N,S,E] -> [T,E] (tiny XLA copy).
    x2 = jnp.transpose(source, (1, 0, 2)).reshape(T, E)

    has_mask = attn_mask is not None
    inputs = [x2, w_qkv, wo, w1, w2, vecs]
    if has_mask:
        m = attn_mask.astype(jnp.float32)
        if m.ndim == 2:
            m = m[None]
        inputs.append(jnp.broadcast_to(m, (N, S, S)))   # raw additive mask, combined in-kernel

    kernel = _make_kernel(n_batch=N, seq=S, num_heads=H, head_dim=dh,
                          emb=E, ffn=F, has_mask=has_mask)

    out2 = pl.pallas_call(
        kernel,
        out_shape=jax.ShapeDtypeStruct((T, E), source.dtype),
    )(*inputs)

    return jnp.transpose(out2.reshape(N, S, E), (1, 0, 2))


# ----------------------------- parameter packing ------------------------------
def pack_params(params):
    """Pack the 16 raw parameters into 5 kernel operands.

    Weight matrices are stored bf16 (halves weight HBM traffic; kernel math stays f32).
    All 1-D params go into one (8,128) f32 blob, one param per sublane row (lane-0 aligned).
    """
    (wq, bq, wk, bk, wv, bv, wo, bo,
     ln1_g, ln1_b, w1, b1, w2, b2, ln2_g, ln2_b) = params
    E, F = wq.shape[0], w1.shape[1]
    assert 3 * E <= 128 and F <= 128, "packed-vector rows must fit in 128 lanes"

    w_qkv = jnp.concatenate([wq, wk, wv], axis=1).astype(jnp.bfloat16)   # (E, 3E)
    b_qkv = jnp.concatenate([bq, bk, bv], axis=1)                        # (1, 3E)

    def row(p):
        p = p.reshape(-1).astype(jnp.float32)
        return jnp.pad(p, (0, 128 - p.shape[0]))[None, :]

    vecs = jnp.concatenate(
        [row(b_qkv), row(bo), row(b1), row(b2),
         row(ln1_g), row(ln1_b), row(ln2_g), row(ln2_b)], axis=0)        # (8, 128) f32
    return (w_qkv, wo.astype(jnp.bfloat16), w1.astype(jnp.bfloat16),
            w2.astype(jnp.bfloat16), vecs)


# ----------------------------- pure-JAX reference -----------------------------
def _reference(source, attn_mask, params):
    """f32 reference.  Uses the same bf16-quantized weights as the kernel and HIGHEST matmul
    precision so it matches the kernel's full-precision f32 MXU matmuls (instead of XLA's
    default reduced-precision f32 matmuls on TPU)."""
    (wq, bq, wk, bk, wv, bv, wo, bo,
     ln1_g, ln1_b, w1, b1, w2, b2, ln2_g, ln2_b) = params
    quant = lambda w: w.astype(jnp.bfloat16).astype(jnp.float32)
    wq, wk, wv, wo, w1, w2 = (quant(w) for w in (wq, wk, wv, wo, w1, w2))

    P = jax.lax.Precision.HIGHEST
    dot = lambda a, b: jnp.dot(a, b, precision=P)

    x = jnp.transpose(source, (1, 0, 2)).astype(jnp.float32)   # [N,S,E]
    N, S, E = x.shape
    dh = E // NUM_HEADS
    scale = 1.0 / (dh ** 0.5)
    mask = (jnp.zeros((N, S, S), jnp.float32) if attn_mask is None
            else jnp.broadcast_to(attn_mask.astype(jnp.float32), (N, S, S)))

    def ln(v, g, b):
        m = jnp.mean(v, -1, keepdims=True)
        va = jnp.mean((v - m) ** 2, -1, keepdims=True)
        return (v - m) * jax.lax.rsqrt(va + LN_EPS) * g + b

    q = (dot(x, wq) + bq).reshape(N, S, NUM_HEADS, dh).transpose(0, 2, 1, 3)
    k = (dot(x, wk) + bk).reshape(N, S, NUM_HEADS, dh).transpose(0, 2, 1, 3)
    v = (dot(x, wv) + bv).reshape(N, S, NUM_HEADS, dh).transpose(0, 2, 1, 3)
    s = jnp.einsum("nhqd,nhkd->nhqk", q, k, precision=P) * scale + mask[:, None]
    p = jax.nn.softmax(s, axis=-1)
    ctx = jnp.einsum("nhqk,nhkd->nhqd", p, v,
                     precision=P).transpose(0, 2, 1, 3).reshape(N, S, E)
    attn_out = dot(ctx, wo) + bo
    y = ln(attn_out + x, ln1_g, ln1_b)
    ffn_out = dot(jnp.maximum(dot(y, w1) + b1, 0.0), w2) + b2
    z = ln(ffn_out + y, ln2_g, ln2_b)
    return jnp.transpose(z, (1, 0, 2))


def make_params(key):
    keys = jax.random.split(key, 8)

    def lin(k, fan_in, fan_out):
        lim = 1.0 / (fan_in ** 0.5)
        kw, kb = jax.random.split(k)
        w = jax.random.uniform(kw, (fan_in, fan_out), jnp.float32, -lim, lim)
        b = jax.random.uniform(kb, (1, fan_out), jnp.float32, -lim, lim)
        return w, b

    wq, bq = lin(keys[0], EMB_SIZE, EMB_SIZE)
    wk, bk = lin(keys[1], EMB_SIZE, EMB_SIZE)
    wv, bv = lin(keys[2], EMB_SIZE, EMB_SIZE)
    wo, bo = lin(keys[3], EMB_SIZE, EMB_SIZE)
    w1, b1 = lin(keys[4], EMB_SIZE, FFN_SIZE)
    w2, b2 = lin(keys[5], FFN_SIZE, EMB_SIZE)
    ln1_g = jnp.ones((1, EMB_SIZE), jnp.float32)
    ln1_b = jnp.zeros((1, EMB_SIZE), jnp.float32)
    ln2_g = jnp.ones((1, EMB_SIZE), jnp.float32)
    ln2_b = jnp.zeros((1, EMB_SIZE), jnp.float32)
    return (wq, bq, wk, bk, wv, bv, wo, bo,
            ln1_g, ln1_b, w1, b1, w2, b2, ln2_g, ln2_b)


if __name__ == "__main__":
    key = jax.random.PRNGKey(0)
    k_x, k_p = jax.random.split(key)
    # source in PyTorch default layout: [S, N, E] (batch_first=False)
    source = jax.random.normal(k_x, (SEQ_LEN, BATCH, EMB_SIZE), jnp.float32)
    params = make_params(k_p)
    packed = pack_params(params)          # one-time weight packing (like module init)

    # --- no-mask path ------------------------------------------------------------
    out = jax.block_until_ready(transformer_encoder_layer(source, None, packed))
    ref = _reference(source, None, params)
    assert out.shape == (SEQ_LEN, BATCH, EMB_SIZE)
    assert jnp.allclose(out, ref, atol=1e-3, rtol=1e-3), "mismatch vs reference (no mask)"

    # --- additive attn_mask path (exercises in-kernel mask handling) --------------
    causal = jnp.where(
        jnp.triu(jnp.ones((SEQ_LEN, SEQ_LEN), jnp.bool_), k=1), -1e9, 0.0
    ).astype(jnp.float32)
    out_m = jax.block_until_ready(transformer_encoder_layer(source, causal, packed))
    ref_m = _reference(source, causal, params)
    assert jnp.allclose(out_m, ref_m, atol=1e-3, rtol=1e-3), "mismatch vs reference (mask)"

    print("KERNEL_OK")
</pallas_src>

<mosaic_0001>
module attributes {stable_mosaic.version = 11 : i64} {
  func.func @kernel(%arg0: memref<16x32xf32, #tpu.memory_space<vmem>>, %arg1: memref<32x96xbf16, #tpu.memory_space<vmem>>, %arg2: memref<32x32xbf16, #tpu.memory_space<vmem>>, %arg3: memref<32x64xbf16, #tpu.memory_space<vmem>>, %arg4: memref<64x32xbf16, #tpu.memory_space<vmem>>, %arg5: memref<8x128xf32, #tpu.memory_space<vmem>>, %arg6: memref<16x32xf32, #tpu.memory_space<vmem>>) attributes {dimension_semantics = [], scalar_prefetch = 0 : i64, scratch_operands = 0 : i64, tpu.core_type = #tpu.core_type<tc>} {
    %c0 = arith.constant 0 : index
    %c0_0 = arith.constant 0 : index
    %0 = vector.load %arg0[%c0, %c0_0] : memref<16x32xf32, #tpu.memory_space<vmem>>, vector<16x32xf32>
    %c0_1 = arith.constant 0 : index
    %c0_2 = arith.constant 0 : index
    %1 = vector.load %arg5[%c0_1, %c0_2] : memref<8x128xf32, #tpu.memory_space<vmem>>, vector<8x128xf32>
    %2 = vector.extract_strided_slice %1 {offsets = [0, 0], sizes = [1, 96], strides = [1, 1]} : vector<8x128xf32> to vector<1x96xf32>
    %3 = vector.extract_strided_slice %1 {offsets = [1, 0], sizes = [1, 32], strides = [1, 1]} : vector<8x128xf32> to vector<1x32xf32>
    %4 = vector.extract_strided_slice %1 {offsets = [2, 0], sizes = [1, 64], strides = [1, 1]} : vector<8x128xf32> to vector<1x64xf32>
    %5 = vector.extract_strided_slice %1 {offsets = [3, 0], sizes = [1, 32], strides = [1, 1]} : vector<8x128xf32> to vector<1x32xf32>
    %6 = vector.extract_strided_slice %1 {offsets = [4, 0], sizes = [1, 32], strides = [1, 1]} : vector<8x128xf32> to vector<1x32xf32>
    %7 = vector.extract_strided_slice %1 {offsets = [5, 0], sizes = [1, 32], strides = [1, 1]} : vector<8x128xf32> to vector<1x32xf32>
    %8 = vector.extract_strided_slice %1 {offsets = [6, 0], sizes = [1, 32], strides = [1, 1]} : vector<8x128xf32> to vector<1x32xf32>
    %9 = vector.extract_strided_slice %1 {offsets = [7, 0], sizes = [1, 32], strides = [1, 1]} : vector<8x128xf32> to vector<1x32xf32>
    %c0_3 = arith.constant 0 : index
    %c0_4 = arith.constant 0 : index
    %10 = vector.load %arg1[%c0_3, %c0_4] : memref<32x96xbf16, #tpu.memory_space<vmem>>, vector<32x96xbf16>
    %cst = arith.constant dense<0.000000e+00> : vector<16x96xf32>
    %11 = tpu.matmul %0, %10, %cst {dimension_numbers = #tpu.dot_dimension_numbers<[1], [0], [0], [1], [0, 0, 1, 1], [], []>} : vector<16x32xf32>, vector<32x96xbf16>, vector<16x96xf32> -> vector<16x96xf32>
    %12 = vector.broadcast %2 : vector<1x96xf32> to vector<16x96xf32>
    %13 = arith.addf %11, %12 : vector<16x96xf32>
    %14 = vector.extract_strided_slice %13 {offsets = [0, 0], sizes = [16, 8], strides = [1, 1]} : vector<16x96xf32> to vector<16x8xf32>
    %15 = vector.shape_cast %14 : vector<16x8xf32> to vector<2x8x8xf32>
    %16 = vector.extract_strided_slice %13 {offsets = [0, 8], sizes = [16, 8], strides = [1, 1]} : vector<16x96xf32> to vector<16x8xf32>
    %17 = vector.shape_cast %16 : vector<16x8xf32> to vector<2x8x8xf32>
    %18 = vector.extract_strided_slice %13 {offsets = [0, 16], sizes = [16, 8], strides = [1, 1]} : vector<16x96xf32> to vector<16x8xf32>
    %19 = vector.shape_cast %18 : vector<16x8xf32> to vector<2x8x8xf32>
    %20 = vector.extract_strided_slice %13 {offsets = [0, 24], sizes = [16, 8], strides = [1, 1]} : vector<16x96xf32> to vector<16x8xf32>
    %21 = vector.shape_cast %20 : vector<16x8xf32> to vector<2x8x8xf32>
    %22 = tpu.concatenate %15, %17, %19, %21 in 0 : vector<2x8x8xf32>, vector<2x8x8xf32>, vector<2x8x8xf32>, vector<2x8x8xf32> -> vector<8x8x8xf32>
    %23 = vector.extract_strided_slice %13 {offsets = [0, 32], sizes = [16, 8], strides = [1, 1]} : vector<16x96xf32> to vector<16x8xf32>
    %24 = vector.shape_cast %23 : vector<16x8xf32> to vector<2x8x8xf32>
    %25 = vector.extract_strided_slice %13 {offsets = [0, 40], sizes = [16, 8], strides = [1, 1]} : vector<16x96xf32> to vector<16x8xf32>
    %26 = vector.shape_cast %25 : vector<16x8xf32> to vector<2x8x8xf32>
    %27 = vector.extract_strided_slice %13 {offsets = [0, 48], sizes = [16, 8], strides = [1, 1]} : vector<16x96xf32> to vector<16x8xf32>
    %28 = vector.shape_cast %27 : vector<16x8xf32> to vector<2x8x8xf32>
    %29 = vector.extract_strided_slice %13 {offsets = [0, 56], sizes = [16, 8], strides = [1, 1]} : vector<16x96xf32> to vector<16x8xf32>
    %30 = vector.shape_cast %29 : vector<16x8xf32> to vector<2x8x8xf32>
    %31 = tpu.concatenate %24, %26, %28, %30 in 0 : vector<2x8x8xf32>, vector<2x8x8xf32>, vector<2x8x8xf32>, vector<2x8x8xf32> -> vector<8x8x8xf32>
    %32 = vector.extract_strided_slice %13 {offsets = [0, 64], sizes = [16, 8], strides = [1, 1]} : vector<16x96xf32> to vector<16x8xf32>
    %33 = vector.shape_cast %32 : vector<16x8xf32> to vector<2x8x8xf32>
    %34 = vector.extract_strided_slice %13 {offsets = [0, 72], sizes = [16, 8], strides = [1, 1]} : vector<16x96xf32> to vector<16x8xf32>
    %35 = vector.shape_cast %34 : vector<16x8xf32> to vector<2x8x8xf32>
    %36 = vector.extract_strided_slice %13 {offsets = [0, 80], sizes = [16, 8], strides = [1, 1]} : vector<16x96xf32> to vector<16x8xf32>
    %37 = vector.shape_cast %36 : vector<16x8xf32> to vector<2x8x8xf32>
    %38 = vector.extract_strided_slice %13 {offsets = [0, 88], sizes = [16, 8], strides = [1, 1]} : vector<16x96xf32> to vector<16x8xf32>
    %39 = vector.shape_cast %38 : vector<16x8xf32> to vector<2x8x8xf32>
    %40 = tpu.concatenate %33, %35, %37, %39 in 0 : vector<2x8x8xf32>, vector<2x8x8xf32>, vector<2x8x8xf32>, vector<2x8x8xf32> -> vector<8x8x8xf32>
    "tpu.trace_start"() <{level = 10 : i32, message = "bqd,bkd->bqk"}> : () -> ()
    %cst_5 = arith.constant dense<0.000000e+00> : vector<8x8x8xf32>
    %41 = tpu.matmul %22, %31, %cst_5 {dimension_numbers = #tpu.dot_dimension_numbers<[2], [2], [1], [1], [0, 0, 0, 1, 1, 1], [0], [0]>} : vector<8x8x8xf32>, vector<8x8x8xf32>, vector<8x8x8xf32> -> vector<8x8x8xf32>
    "tpu.trace_stop"() : () -> ()
    %cst_6 = arith.constant 0.353553385 : f32
    %42 = vector.broadcast %cst_6 : f32 to vector<8x8x8xf32>
    %43 = arith.mulf %41, %42 : vector<8x8x8xf32>
    %cst_7 = arith.constant dense<0xFF800000> : vector<8x8xf32>
    %44 = vector.multi_reduction <maximumf>, %43, %cst_7 [2] : vector<8x8x8xf32> to vector<8x8xf32>
    %45 = vector.shape_cast %44 : vector<8x8xf32> to vector<8x8x1xf32>
    %46 = vector.broadcast %45 : vector<8x8x1xf32> to vector<8x8x8xf32>
    %47 = arith.subf %43, %46 : vector<8x8x8xf32>
    %48 = math.exp %47 : vector<8x8x8xf32>
    %cst_8 = arith.constant dense<0.000000e+00> : vector<8x8xf32>
    %49 = vector.multi_reduction <add>, %48, %cst_8 [2] : vector<8x8x8xf32> to vector<8x8xf32>
    %50 = vector.shape_cast %49 : vector<8x8xf32> to vector<8x8x1xf32>
    %51 = tpu.reciprocal %50 : vector<8x8x1xf32> -> vector<8x8x1xf32>
    %52 = vector.broadcast %51 : vector<8x8x1xf32> to vector<8x8x8xf32>
    %53 = arith.mulf %48, %52 : vector<8x8x8xf32>
    "tpu.trace_start"() <{level = 10 : i32, message = "bqk,bkd->bqd"}> : () -> ()
    %cst_9 = arith.constant dense<0.000000e+00> : vector<8x8x8xf32>
    %54 = tpu.matmul %53, %40, %cst_9 {dimension_numbers = #tpu.dot_dimension_numbers<[2], [1], [1], [2], [0, 0, 0, 1, 1, 2], [0], [0]>} : vector<8x8x8xf32>, vector<8x8x8xf32>, vector<8x8x8xf32> -> vector<8x8x8xf32>
    "tpu.trace_stop"() : () -> ()
    %55 = vector.extract_strided_slice %54 {offsets = [0, 0, 0], sizes = [2, 8, 8], strides = [1, 1, 1]} : vector<8x8x8xf32> to vector<2x8x8xf32>
    %56 = vector.extract_strided_slice %54 {offsets = [2, 0, 0], sizes = [2, 8, 8], strides = [1, 1, 1]} : vector<8x8x8xf32> to vector<2x8x8xf32>
    %57 = vector.extract_strided_slice %54 {offsets = [4, 0, 0], sizes = [2, 8, 8], strides = [1, 1, 1]} : vector<8x8x8xf32> to vector<2x8x8xf32>
    %58 = vector.extract_strided_slice %54 {offsets = [6, 0, 0], sizes = [2, 8, 8], strides = [1, 1, 1]} : vector<8x8x8xf32> to vector<2x8x8xf32>
    %59 = tpu.concatenate %55, %56, %57, %58 in 2 : vector<2x8x8xf32>, vector<2x8x8xf32>, vector<2x8x8xf32>, vector<2x8x8xf32> -> vector<2x8x32xf32>
    %60 = vector.shape_cast %59 : vector<2x8x32xf32> to vector<16x32xf32>
    %c0_10 = arith.constant 0 : index
    %c0_11 = arith.constant 0 : index
    %61 = vector.load %arg2[%c0_10, %c0_11] : memref<32x32xbf16, #tpu.memory_space<vmem>>, vector<32x32xbf16>
    %cst_12 = arith.constant dense<0.000000e+00> : vector<16x32xf32>
    %62 = tpu.matmul %60, %61, %cst_12 {dimension_numbers = #tpu.dot_dimension_numbers<[1], [0], [0], [1], [0, 0, 1, 1], [], []>} : vector<16x32xf32>, vector<32x32xbf16>, vector<16x32xf32> -> vector<16x32xf32>
    %63 = vector.broadcast %3 : vector<1x32xf32> to vector<16x32xf32>
    %64 = arith.addf %62, %63 : vector<16x32xf32>
    %65 = arith.addf %64, %0 : vector<16x32xf32>
    %cst_13 = arith.constant dense<0.000000e+00> : vector<16xf32>
    %66 = vector.multi_reduction <add>, %65, %cst_13 [1] : vector<16x32xf32> to vector<16xf32>
    %67 = vector.shape_cast %66 : vector<16xf32> to vector<16x1xf32>
    %cst_14 = arith.constant 3.200000e+01 : f32
    %68 = vector.broadcast %cst_14 : f32 to vector<16x1xf32>
    %69 = arith.divf %67, %68 : vector<16x1xf32>
    %70 = vector.broadcast %69 : vector<16x1xf32> to vector<16x32xf32>
    %71 = arith.subf %65, %70 : vector<16x32xf32>
    %72 = arith.mulf %71, %71 : vector<16x32xf32>
    %cst_15 = arith.constant dense<0.000000e+00> : vector<16xf32>
    %73 = vector.multi_reduction <add>, %72, %cst_15 [1] : vector<16x32xf32> to vector<16xf32>
    %74 = vector.shape_cast %73 : vector<16xf32> to vector<16x1xf32>
    %cst_16 = arith.constant 3.200000e+01 : f32
    %75 = vector.broadcast %cst_16 : f32 to vector<16x1xf32>
    %76 = arith.divf %74, %75 : vector<16x1xf32>
    %77 = vector.broadcast %69 : vector<16x1xf32> to vector<16x32xf32>
    %78 = arith.subf %65, %77 : vector<16x32xf32>
    %cst_17 = arith.constant 9.99999974E-6 : f32
    %79 = vector.broadcast %cst_17 : f32 to vector<16x1xf32>
    %80 = arith.addf %76, %79 : vector<16x1xf32>
    %81 = math.rsqrt %80 : vector<16x1xf32>
    %82 = vector.broadcast %81 : vector<16x1xf32> to vector<16x32xf32>
    %83 = arith.mulf %78, %82 : vector<16x32xf32>
    %84 = vector.broadcast %6 : vector<1x32xf32> to vector<16x32xf32>
    %85 = arith.mulf %83, %84 : vector<16x32xf32>
    %86 = vector.broadcast %7 : vector<1x32xf32> to vector<16x32xf32>
    %87 = arith.addf %85, %86 : vector<16x32xf32>
    %c0_18 = arith.constant 0 : index
    %c0_19 = arith.constant 0 : index
    %88 = vector.load %arg3[%c0_18, %c0_19] : memref<32x64xbf16, #tpu.memory_space<vmem>>, vector<32x64xbf16>
    %cst_20 = arith.constant dense<0.000000e+00> : vector<16x64xf32>
    %89 = tpu.matmul %87, %88, %cst_20 {dimension_numbers = #tpu.dot_dimension_numbers<[1], [0], [0], [1], [0, 0, 1, 1], [], []>} : vector<16x32xf32>, vector<32x64xbf16>, vector<16x64xf32> -> vector<16x64xf32>
    %90 = vector.broadcast %4 : vector<1x64xf32> to vector<16x64xf32>
    %91 = arith.addf %89, %90 : vector<16x64xf32>
    %cst_21 = arith.constant 0.000000e+00 : f32
    %92 = vector.broadcast %cst_21 : f32 to vector<16x64xf32>
    %93 = arith.maximumf %91, %92 : vector<16x64xf32>
    %c0_22 = arith.constant 0 : index
    %c0_23 = arith.constant 0 : index
    %94 = vector.load %arg4[%c0_22, %c0_23] : memref<64x32xbf16, #tpu.memory_space<vmem>>, vector<64x32xbf16>
    %cst_24 = arith.constant dense<0.000000e+00> : vector<16x32xf32>
    %95 = tpu.matmul %93, %94, %cst_24 {dimension_numbers = #tpu.dot_dimension_numbers<[1], [0], [0], [1], [0, 0, 1, 1], [], []>} : vector<16x64xf32>, vector<64x32xbf16>, vector<16x32xf32> -> vector<16x32xf32>
    %96 = vector.broadcast %5 : vector<1x32xf32> to vector<16x32xf32>
    %97 = arith.addf %95, %96 : vector<16x32xf32>
    %98 = arith.addf %97, %87 : vector<16x32xf32>
    %cst_25 = arith.constant dense<0.000000e+00> : vector<16xf32>
    %99 = vector.multi_reduction <add>, %98, %cst_25 [1] : vector<16x32xf32> to vector<16xf32>
    %100 = vector.shape_cast %99 : vector<16xf32> to vector<16x1xf32>
    %cst_26 = arith.constant 3.200000e+01 : f32
    %101 = vector.broadcast %cst_26 : f32 to vector<16x1xf32>
    %102 = arith.divf %100, %101 : vector<16x1xf32>
    %103 = vector.broadcast %102 : vector<16x1xf32> to vector<16x32xf32>
    %104 = arith.subf %98, %103 : vector<16x32xf32>
    %105 = arith.mulf %104, %104 : vector<16x32xf32>
    %cst_27 = arith.constant dense<0.000000e+00> : vector<16xf32>
    %106 = vector.multi_reduction <add>, %105, %cst_27 [1] : vector<16x32xf32> to vector<16xf32>
    %107 = vector.shape_cast %106 : vector<16xf32> to vector<16x1xf32>
    %cst_28 = arith.constant 3.200000e+01 : f32
    %108 = vector.broadcast %cst_28 : f32 to vector<16x1xf32>
    %109 = arith.divf %107, %108 : vector<16x1xf32>
    %110 = vector.broadcast %102 : vector<16x1xf32> to vector<16x32xf32>
    %111 = arith.subf %98, %110 : vector<16x32xf32>
    %cst_29 = arith.constant 9.99999974E-6 : f32
    %112 = vector.broadcast %cst_29 : f32 to vector<16x1xf32>
    %113 = arith.addf %109, %112 : vector<16x1xf32>
    %114 = math.rsqrt %113 : vector<16x1xf32>
    %115 = vector.broadcast %114 : vector<16x1xf32> to vector<16x32xf32>
    %116 = arith.mulf %111, %115 : vector<16x32xf32>
    %117 = vector.broadcast %8 : vector<1x32xf32> to vector<16x32xf32>
    %118 = arith.mulf %116, %117 : vector<16x32xf32>
    %119 = vector.broadcast %9 : vector<1x32xf32> to vector<16x32xf32>
    %120 = arith.addf %118, %119 : vector<16x32xf32>
    %c0_30 = arith.constant 0 : index
    %c0_31 = arith.constant 0 : index
    %121 = vector.load %arg6[%c0_30, %c0_31] : memref<16x32xf32, #tpu.memory_space<vmem>>, vector<16x32xf32>
    tpu.vector_store %arg6[%c0_30, %c0_31], %120 {strides = array<i32>} : memref<16x32xf32, #tpu.memory_space<vmem>>, vector<16x32xf32>,
    return
  }
}

</mosaic_0001>

<bundles_post_ra>
// kernel: transformer_encoder_layer.1
= control target key start
LH: loop header
LB: loop body
LE: loop exit
PB: predicated region body
PF: predicated region fallthrough
CT: control target
= control target key end

     0   :  { %vm47_vm0 = vcmask 261120   ;;  %v31_v4 = vlaneseq  ;;  %v2033_v10 = vmov 0.0   ;;  %s2035_s30 = smov 120   ;;  %vm2036_vm1 = vmmov 0   ;;  %s2038_s7 = smov 96   ;;  %s2327_s1 = inlined_call_operand.vmem [shape: bf16[32,96], index: 1, kind: input, shape index: {}]   ;;  %s2328_s0 = inlined_call_operand.vmem [shape: f32[16,32], index: 0, kind: input, shape index: {}]   ;;  %s2329_s5 = inlined_call_operand.vmem [shape: f32[8,128], index: 5, kind: input, shape index: {}]   ;;  %s2330_s2 = inlined_call_operand.vmem [shape: bf16[32,32], index: 2, kind: input, shape index: {}]   ;;  %s2331_s3 = inlined_call_operand.vmem [shape: bf16[32,64], index: 3, kind: input, shape index: {}]   ;;  %s2332_s4 = inlined_call_operand.vmem [shape: bf16[64,32], index: 4, kind: input, shape index: {}]   ;;  %s2333_s6 = inlined_call_operand.vmem [shape: f32[16,32], index: 6, kind: output, shape index: {}]  }
   0x1   :  { %v1983_v0 = vld [vmem:[%s2327_s1 + $0x8] sm:$0xff]   ;;  %v1984_v1 = vld [vmem:[%s2327_s1] sm:$0xff]   ;;  %1878 = vmatprep.subr.mxu0 %v2033_v10  ;;  %1880 = vmatprep.mubr.msk.f32.mxu0 %vm2036_vm1, %v2033_v10  ;;  %vm113_vm2 = vcmask 64512   ;;  %s2039_s8 = smov 64   ;;  %s2040_s13 = smov 8   ;;  %vm1450_vm3 = vcmask 130048  }
   0x2   :  { %1861 = vmatprep.subr.bf16.mxu1 %v1983_v0  ;;  %v2087_v2 = vld [vmem:[%s2328_s0] sm:$0xff]  ;;  %v2094_v3 = vld [vmem:[%s2328_s0 + $0x8] sm:$0xff]  ;;  %v2098_v5 = vshrl.u32 %v31_v4, 7  ;;  %s2034_s0 = smov 112   ;;  %s2041_s14 = smov 16   ;;  %vm1453_vm4 = vcmask 195584  }
   0x3   :  { %1862 = vmatpush3.bf16.msra.mxu1 %v1983_v0  ;;  %1865 = vmatprep.mubr.msk.f32.mxu1 %vm47_vm0, %v2087_v2  ;;  %v2104_v7 = vld [vmem:[%s2329_s5] sm:$0xff]  ;;  %s2037_s5 = smov 104   ;;  %s2042_s15 = smov 24   ;;  %vm1673_vm5 = vcmask 523264  }
   0x4   :  { %1863 = vmatprep.subr.bf16.mxu1 %v1984_v1  ;;  %v33_v6 = vsub.s32 0, %v2098_v5 }
   0x6   :  { %v34_v9 = vrot.slane %v2104_v7, %v33_v6 }
   0x7   :  { %1864 = vmatpush3.bf16.msra.mxu1 %v1984_v1 }
   0x8   :  { %1868 = vmatprep.subr.mxu1 %v2033_v10 }
   0xa   :  { %1866 = vmatmul.mubr.msk.f32.vlgmr.msra.gmra.mxu1 %vm47_vm0, %v2094_v3 }
   0xb   :  { %1870 = vmatprep.mubr.msk.f32.mxu1 %vm2036_vm1, %v2033_v10 }
  0xca   :  { %v1867_v8 = vpop.f32.mrf.mxu1 }
  0xcb   :  { %v2117_v13 = vadd.f32 %v1867_v8, %v34_v9 }
  0xcc   :  { %v88_v11 = vpop.f32.mrf.mxu1 }
  0xcd   :  { %v2109_v12 = vadd.f32 %v88_v11, %v34_v9 }
  0xcf   :  { %103 = vrot.lane.b32.xlu1 %v2109_v12, %s2034_s0  ;;  %99 = vrot.lane.b32.xlu0 %v2109_v12, %s2035_s30 }
  0xd3   :  { %105 = vrot.lane.b32.xlu1 %v2117_v13, %s2034_s0  ;;  %101 = vrot.lane.b32.xlu0 %v2117_v13, %s2035_s30 }
  0xd7   :  { %109 = vrot.lane.b32.xlu1 %v2117_v13, %s2037_s5  ;;  %107 = vrot.lane.b32.xlu0 %v2109_v12, %s2037_s5 }
  0xdb   :  { %188 = vrot.lane.b32.xlu1 %v2117_v13, %s2038_s7  ;;  %111 = vrot.lane.b32.xlu0 %v2109_v12, %s2038_s7 }
 0x141   :  { %v2125_v14 = vpop.permute.xlu1 %103  ;;  %v2127_v15 = vpop.permute.xlu0 %99 }
 0x142   :  { %264 = vrot.lane.b32.xlu0 %v2127_v15, %s2038_s7 }
 0x145   :  { %v2130_v16 = vpop.permute.xlu1 %105  ;;  %v2132_v17 = vpop.permute.xlu0 %101 }
 0x146   :  { %416 = vrot.lane.b32.xlu0 %v2125_v14, %s2038_s7  ;;  %340 = vrot.lane.b32.xlu1 %v2132_v17, %s2038_s7 }
 0x149   :  { %v2136_v18 = vpop.permute.xlu0 %107  ;;  %v2140_v19 = vpop.permute.xlu1 %109 }
 0x14a   :  { %492 = vrot.lane.b32.xlu1 %v2130_v16, %s2038_s7  ;;  %568 = vrot.lane.b32.xlu0 %v2136_v18, %s2038_s7 }
 0x14d   :  { %v112_v20 = vpop.permute.xlu0 %111  ;;  %v189_v21 = vpop.permute.xlu1 %188 }
 0x14e   :  { %644 = vrot.lane.b32.xlu1 %v2140_v19, %s2038_s7  ;;  %1869 = vmatpush3.xpose.msk.msra.mxu1 %vm113_vm2, %v112_v20 }
 0x14f   :  { %1873 = vmatprep.subr.mxu1 %v2033_v10 }
 0x151   :  { %1871 = vmatmul.mubr.msk.f32.vlgmr.msra.gmra.mxu1 %vm113_vm2, %v2109_v12 }
 0x152   :  { %1874 = vmatpush3.xpose.msk.msra.mxu1 %vm113_vm2, %v189_v21  ;;  %1875 = vmatprep.mubr.msk.f32.mxu1 %vm2036_vm1, %v2033_v10 }
 0x153   :  { %1883 = vmatprep.subr.mxu1 %v2033_v10 }
 0x155   :  { %1876 = vmatmul.mubr.msk.f32.vlgmr.msra.gmra.mxu1 %vm113_vm2, %v2117_v13 }
 0x156   :  { %1885 = vmatprep.mubr.msk.f32.mxu1 %vm2036_vm1, %v2033_v10 }
 0x1b4   :  { %v265_v22 = vpop.permute.xlu0 %264 }
 0x1b5   :  { %1879 = vmatpush3.xpose.msk.msra.mxu0 %vm113_vm2, %v265_v22 }
 0x1b6   :  { %1888 = vmatprep.subr.mxu0 %v2033_v10 }
 0x1b8   :  { %v341_v23 = vpop.permute.xlu1 %340  ;;  %1881 = vmatmul.mubr.msk.f32.vlgmr.msra.gmra.mxu0 %vm113_vm2, %v2127_v15  ;;  %v417_v24 = vpop.permute.xlu0 %416 }
 0x1b9   :  { %1884 = vmatpush3.xpose.msk.msra.mxu1 %vm113_vm2, %v341_v23  ;;  %1889 = vmatpush3.xpose.msk.msra.mxu0 %vm113_vm2, %v417_v24 }
 0x1ba   :  { %1890 = vmatprep.mubr.msk.f32.mxu0 %vm2036_vm1, %v2033_v10  ;;  %1893 = vmatprep.subr.mxu1 %v2033_v10 }
 0x1bb   :  { %1898 = vmatprep.subr.mxu0 %v2033_v10 }
 0x1bc   :  { %v493_v25 = vpop.permute.xlu1 %492  ;;  %1886 = vmatmul.mubr.msk.f32.vlgmr.msra.gmra.mxu1 %vm113_vm2, %v2132_v17  ;;  %1891 = vmatmul.mubr.msk.f32.vlgmr.msra.gmra.mxu0 %vm113_vm2, %v2125_v14  ;;  %v569_v26 = vpop.permute.xlu0 %568 }
 0x1bd   :  { %1894 = vmatpush3.xpose.msk.msra.mxu1 %vm113_vm2, %v493_v25  ;;  %1899 = vmatpush3.xpose.msk.msra.mxu0 %vm113_vm2, %v569_v26 }
 0x1be   :  { %1895 = vmatprep.mubr.msk.f32.mxu1 %vm2036_vm1, %v2033_v10  ;;  %1900 = vmatprep.mubr.msk.f32.mxu0 %vm2036_vm1, %v2033_v10 }
 0x1bf   :  { %1903 = vmatprep.subr.mxu1 %v2033_v10  ;;  %1908 = vmatprep.subr.mxu0 %v2033_v10 }
 0x1c0   :  { %v645_v27 = vpop.permute.xlu1 %644  ;;  %1896 = vmatmul.mubr.msk.f32.vlgmr.msra.gmra.mxu1 %vm113_vm2, %v2130_v16  ;;  %1901 = vmatmul.mubr.msk.f32.vlgmr.msra.gmra.mxu0 %vm113_vm2, %v2136_v18 }
 0x1c1   :  { %1904 = vmatpush3.xpose.msk.msra.mxu1 %vm113_vm2, %v645_v27  ;;  %1905 = vmatprep.mubr.msk.f32.mxu1 %vm2036_vm1, %v2033_v10 }
 0x1c2   :  { %1913 = vmatprep.subr.mxu1 %v2033_v10  ;;  %1910 = vmatprep.mubr.msk.f32.mxu0 %vm2036_vm1, %v2033_v10 }
 0x1c4   :  { %1906 = vmatmul.mubr.msk.f32.vlgmr.msra.gmra.mxu1 %vm113_vm2, %v2140_v19 }
 0x1c5   :  { %1915 = vmatprep.mubr.msk.f32.mxu1 %vm2036_vm1, %v2033_v10 }
 0x211   :  { %v184_v28 = vpop.f32.mrf.mxu1 }
 0x212   :  { %v720_v29 = vmul.f32 0.35355338, %v184_v28 }
 0x213   :  { %v1872_v30 = vpop.f32.mrf.mxu1 }
 0x214   :  { %v728_v31 = vsel %vm113_vm2, %v720_v29, -inf }
 0x215   :  { %729 = vmax.xlane.f32.xlu0 %v728_v31  ;;  %v260_v32 = vpop.f32.mrf.mxu1 }
 0x216   :  { %v721_v33 = vmul.f32 0.35355338, %v260_v32 }
 0x217   :  { %v1877_v34 = vpop.f32.mrf.mxu1 }
 0x218   :  { %v731_v35 = vsel %vm113_vm2, %v721_v33, -inf }
 0x219   :  { %732 = vmax.xlane.f32.xlu1 %v731_v35 }
 0x278   :  { %v336_v36 = vpop.f32.mrf.mxu0 }
 0x279   :  { %v722_v37 = vmul.f32 0.35355338, %v336_v36 }
 0x27a   :  { %v1882_v38 = vpop.f32.mrf.mxu0 }
 0x27b   :  { %v734_v39 = vsel %vm113_vm2, %v722_v37, -inf }
 0x27c   :  { %v412_v40 = vpop.f32.mrf.mxu1  ;;  %735 = vmax.xlane.f32.xlu0 %v734_v39  ;;  %v488_v41 = vpop.f32.mrf.mxu0 }
 0x27d   :  { %v723_v42 = vmul.f32 0.35355338, %v412_v40  ;;  %v724_v43 = vmul.f32 0.35355338, %v488_v41 }
 0x27e   :  { %v1887_v44 = vpop.f32.mrf.mxu1  ;;  %v1892_v45 = vpop.f32.mrf.mxu0 }
 0x27f   :  { %v737_v46 = vsel %vm113_vm2, %v723_v42, -inf  ;;  %v740_v47 = vsel %vm113_vm2, %v724_v43, -inf }
 0x280   :  { %v564_v48 = vpop.f32.mrf.mxu1  ;;  %738 = vmax.xlane.f32.xlu0 %v737_v46  ;;  %741 = vmax.xlane.f32.xlu1 %v740_v47  ;;  %v640_v49 = vpop.f32.mrf.mxu0 }
 0x281   :  { %v725_v50 = vmul.f32 0.35355338, %v564_v48  ;;  %v726_v51 = vmul.f32 0.35355338, %v640_v49 }
 0x282   :  { %v1897_v52 = vpop.f32.mrf.mxu1  ;;  %v1902_v53 = vpop.f32.mrf.mxu0 }
 0x283   :  { %v743_v54 = vsel %vm113_vm2, %v725_v50, -inf  ;;  %v746_v55 = vsel %vm113_vm2, %v726_v51, -inf }
 0x284   :  { %v716_v56 = vpop.f32.mrf.mxu1  ;;  %744 = vmax.xlane.f32.xlu0 %v743_v54  ;;  %747 = vmax.xlane.f32.xlu1 %v746_v55 }
 0x285   :  { %v727_v57 = vmul.f32 0.35355338, %v716_v56 }
 0x286   :  { %v1907_v58 = vpop.f32.mrf.mxu1 }
 0x287   :  { %v749_v59 = vsel %vm113_vm2, %v727_v57, -inf }
 0x288   :  { %750 = vmax.xlane.f32.xlu0 %v749_v59 }
 0x295   :  { %816 = vrot.lane.b32.xlu1 %v2109_v12, %s2039_s8 }
 0x299   :  { %968 = vrot.lane.b32.xlu1 %v2127_v15, %s2039_s8 }
 0x29d   :  { %1044 = vrot.lane.b32.xlu1 %v2132_v17, %s2039_s8 }
 0x29e   :  { %892 = vrot.lane.b32.xlu0 %v2117_v13, %s2039_s8  ;;  %v730_v62 = vpop.xlane.xlu0 %729 }
 0x29f   :  { %v752_v63 = vsub.f32 %v720_v29, %v730_v62 }
 0x2a1   :  { %1196 = vrot.lane.b32.xlu1 %v2130_v16, %s2039_s8  ;;  %v760_v1 = vmul.f32 1.442695, %v752_v63 }
 0x2a2   :  { %1120 = vrot.lane.b32.xlu0 %v2125_v14, %s2039_s8  ;;  %v733_v60 = vpop.xlane.xlu1 %732 }
 0x2a3   :  { %v753_v61 = vsub.f32 %v721_v33, %v733_v60 }
 0x2a5   :  { %v762_v0 = vmul.f32 1.442695, %v753_v61 }
 0x2a7   :  { %1993 = vpow2.f32 %v762_v0 }
 0x2a8   :  { %1995 = vpow2.f32 %v760_v1 }
 0x2b4   :  { %v2211_v4 = vpop.eup %1993 }
 0x2b5   :  { %v779_v6 = vsel %vm113_vm2, %v2211_v4, 0.0  ;;  %v2215_v8 = vpop.eup %1995 }
 0x2b6   :  { %v776_v9 = vsel %vm113_vm2, %v2215_v8, 0.0 }
 0x2c1   :  { %780 = vadd.xlane.f32.xlu0 %v779_v6 }
 0x2c5   :  { %777 = vadd.xlane.f32.xlu1 %v776_v9 }
 0x305   :  { %v736_v11 = vpop.xlane.xlu0 %735 }
 0x306   :  { %v754_v12 = vsub.f32 %v722_v37, %v736_v11 }
 0x308   :  { %v764_v13 = vmul.f32 1.442695, %v754_v12 }
 0x309   :  { %v742_v14 = vpop.xlane.xlu1 %741  ;;  %v739_v15 = vpop.xlane.xlu0 %738 }
 0x30a   :  { %1997 = vpow2.f32 %v764_v13  ;;  %v756_v16 = vsub.f32 %v724_v43, %v742_v14  ;;  %v755_v17 = vsub.f32 %v723_v42, %v739_v15 }
 0x30c   :  { %v768_v20 = vmul.f32 1.442695, %v756_v16  ;;  %v766_v21 = vmul.f32 1.442695, %v755_v17 }
 0x30d   :  { %v748_v22 = vpop.xlane.xlu1 %747  ;;  %v745_v23 = vpop.xlane.xlu0 %744 }
 0x30e   :  { %1999 = vpow2.f32 %v768_v20  ;;  %v758_v24 = vsub.f32 %v726_v51, %v748_v22  ;;  %v757_v25 = vsub.f32 %v725_v50, %v745_v23  ;;  %v1985_v20 = vld [vmem:[%s2330_s2 + $0x8] sm:$0xff]  }
 0x30f   :  { %2001 = vpow2.f32 %v766_v21  ;;  %v1986_v21 = vld [vmem:[%s2330_s2] sm:$0xff]  }
 0x310   :  { %v772_v26 = vmul.f32 1.442695, %v758_v24  ;;  %v770_v27 = vmul.f32 1.442695, %v757_v25 }
 0x311   :  { %v817_v28 = vpop.permute.xlu1 %816  ;;  %v751_v29 = vpop.xlane.xlu0 %750 }
 0x312   :  { %2003 = vpow2.f32 %v772_v26  ;;  %v759_v30 = vsub.f32 %v727_v57, %v751_v29  ;;  %1909 = vmatpush3.msra.mxu0 %v817_v28 }
 0x313   :  { %2005 = vpow2.f32 %v770_v27  ;;  %1918 = vmatprep.subr.mxu0 %v2033_v10 }
 0x314   :  { %v774_v31 = vmul.f32 1.442695, %v759_v30 }
 0x315   :  { %v893_v32 = vpop.permute.xlu0 %892  ;;  %v969_v45 = vpop.permute.xlu1 %968 }
 0x316   :  { %2007 = vpow2.f32 %v774_v31  ;;  %1914 = vmatpush3.msra.mxu1 %v893_v32 }
 0x317   :  { %v1998_v33 = vpop.eup %1997  ;;  %1923 = vmatprep.subr.mxu1 %v2033_v10 }
 0x318   :  { %v782_v34 = vsel %vm113_vm2, %v1998_v33, 0.0 }
 0x319   :  { %783 = vadd.xlane.f32.xlu1 %v782_v34  ;;  %v1045_v46 = vpop.permute.xlu1 %1044  ;;  %v1121_v47 = vpop.permute.xlu0 %1120 }
 0x31b   :  { %v2000_v35 = vpop.eup %1999 }
 0x31c   :  { %v2002_v36 = vpop.eup %2001  ;;  %v788_v37 = vsel %vm113_vm2, %v2000_v35, 0.0 }
 0x31d   :  { %789 = vadd.xlane.f32.xlu1 %v788_v37  ;;  %v785_v38 = vsel %vm113_vm2, %v2002_v36, 0.0  ;;  %v1197_v48 = vpop.permute.xlu1 %1196 }
 0x31e   :  { %786 = vadd.xlane.f32.xlu0 %v785_v38 }
 0x31f   :  { %v2004_v39 = vpop.eup %2003 }
 0x320   :  { %v2224_v40 = vpop.eup %2005  ;;  %v794_v41 = vsel %vm113_vm2, %v2004_v39, 0.0 }
 0x321   :  { %795 = vadd.xlane.f32.xlu1 %v794_v41  ;;  %v791_v42 = vsel %vm113_vm2, %v2224_v40, 0.0 }
 0x322   :  { %792 = vadd.xlane.f32.xlu0 %v791_v42 }
 0x323   :  { %v2229_v43 = vpop.eup %2007 }
 0x324   :  { %v797_v44 = vsel %vm113_vm2, %v2229_v43, 0.0 }
 0x326   :  { %798 = vadd.xlane.f32.xlu0 %v797_v44 }
 0x332   :  { %1348 = vrot.lane.b32.xlu1 %v2140_v19, %s2039_s8 }
 0x33c   :  { %1272 = vrot.lane.b32.xlu0 %v2136_v18, %s2039_s8 }
 0x34a   :  { %v781_v49 = vpop.xlane.xlu0 %780 }
 0x34b   :  { %2009 = vrcp.f32 %v781_v49 }
 0x34e   :  { %v778_v50 = vpop.xlane.xlu1 %777 }
 0x34f   :  { %2011 = vrcp.f32 %v778_v50 }
 0x358   :  { %v2010_v51 = vpop.eup %2009 }
 0x359   :  { %v809_v52 = vmul.f32 %v2010_v51, %v2211_v4 }
 0x35b   :  { %1916 = vmatmul.mubr.msk.f32.vlgmr.msra.gmra.mxu1 %vm113_vm2, %v809_v52 }
 0x35c   :  { %v2012_v53 = vpop.eup %2011  ;;  %1924 = vmatpush3.msra.mxu1 %v1045_v46  ;;  %1925 = vmatprep.mubr.msk.f32.mxu1 %vm2036_vm1, %v2033_v10 }
 0x35d   :  { %v808_v18 = vmul.f32 %v2012_v53, %v2215_v8  ;;  %1933 = vmatprep.subr.mxu1 %v2033_v10 }
 0x35f   :  { %1911 = vmatmul.mubr.msk.f32.vlgmr.msra.gmra.mxu0 %vm113_vm2, %v808_v18 }
 0x360   :  { %1919 = vmatpush3.msra.mxu0 %v969_v45  ;;  %1920 = vmatprep.mubr.msk.f32.mxu0 %vm2036_vm1, %v2033_v10  ;;  %v1462_v45 = vsub.s32 1, %v2098_v5 }
 0x361   :  { %1928 = vmatprep.subr.mxu0 %v2033_v10 }
 0x362   :  { %v1463_v46 = vrot.slane %v2104_v7, %v1462_v45 }
 0x3a2   :  { %v784_v19 = vpop.xlane.xlu1 %783 }
 0x3a3   :  { %2013 = vrcp.f32 %v784_v19 }
 0x3a6   :  { %v790_v54 = vpop.xlane.xlu1 %789 }
 0x3a7   :  { %2015 = vrcp.f32 %v790_v54  ;;  %v787_v55 = vpop.xlane.xlu0 %786 }
 0x3a8   :  { %2017 = vrcp.f32 %v787_v55 }
 0x3aa   :  { %v796_v56 = vpop.xlane.xlu1 %795 }
 0x3ab   :  { %2019 = vrcp.f32 %v796_v56  ;;  %v793_v57 = vpop.xlane.xlu0 %792 }
 0x3ac   :  { %2021 = vrcp.f32 %v793_v57 }
 0x3ae   :  { %v1349_v11 = vpop.permute.xlu1 %1348 }
 0x3af   :  { %v799_v58 = vpop.xlane.xlu0 %798 }
 0x3b0   :  { %v2014_v59 = vpop.eup %2013  ;;  %2023 = vrcp.f32 %v799_v58 }
 0x3b1   :  { %v810_v60 = vmul.f32 %v2014_v59, %v1998_v33 }
 0x3b3   :  { %1921 = vmatmul.mubr.msk.f32.vlgmr.msra.gmra.mxu0 %vm113_vm2, %v810_v60  ;;  %v1273_v1 = vpop.permute.xlu0 %1272 }
 0x3b4   :  { %v2016_v61 = vpop.eup %2015  ;;  %1929 = vmatpush3.msra.mxu0 %v1121_v47  ;;  %1930 = vmatprep.mubr.msk.f32.mxu0 %vm2036_vm1, %v2033_v10 }
 0x3b5   :  { %v2018_v62 = vpop.eup %2017  ;;  %1938 = vmatprep.subr.mxu0 %v2033_v10  ;;  %v812_v63 = vmul.f32 %v2016_v61, %v2000_v35 }
 0x3b6   :  { %v811_v0 = vmul.f32 %v2018_v62, %v2002_v36  ;;  %v1988_v62 = vld [vmem:[%s2331_s3] sm:$0xff]  }
 0x3b7   :  { %1931 = vmatmul.mubr.msk.f32.vlgmr.msra.gmra.mxu0 %vm113_vm2, %v812_v63  ;;  %v1989_v63 = vld [vmem:[%s2332_s4 + $0x18] sm:$0xff]  }
 0x3b8   :  { %v2020_v4 = vpop.eup %2019  ;;  %1926 = vmatmul.mubr.msk.f32.vlgmr.msra.gmra.mxu1 %vm113_vm2, %v811_v0  ;;  %1939 = vmatpush3.msra.mxu0 %v1273_v1  ;;  %v1990_v0 = vld [vmem:[%s2332_s4 + $0x10] sm:$0xff]  }
 0x3b9   :  { %v2022_v6 = vpop.eup %2021  ;;  %1934 = vmatpush3.msra.mxu1 %v1197_v48  ;;  %1935 = vmatprep.mubr.msk.f32.mxu1 %vm2036_vm1, %v2033_v10  ;;  %v814_v8 = vmul.f32 %v2020_v4, %v2004_v39 }
 0x3ba   :  { %1940 = vmatprep.mubr.msk.f32.mxu0 %vm2036_vm1, %v2033_v10  ;;  %1943 = vmatprep.subr.mxu1 %v2033_v10  ;;  %v813_v9 = vmul.f32 %v2022_v6, %v2224_v40 }
 0x3bb   :  { %1941 = vmatmul.mubr.msk.f32.vlgmr.msra.gmra.mxu0 %vm113_vm2, %v814_v8  ;;  %1948 = vmatprep.subr.bf16.mxu0 %v1985_v20 }
 0x3bc   :  { %1936 = vmatmul.mubr.msk.f32.vlgmr.msra.gmra.mxu1 %vm113_vm2, %v813_v9  ;;  %1949 = vmatpush3.bf16.msra.mxu0 %v1985_v20 }
 0x3bd   :  { %v2024_v12 = vpop.eup %2023  ;;  %1944 = vmatpush3.msra.mxu1 %v1349_v11  ;;  %1945 = vmatprep.mubr.msk.f32.mxu1 %vm2036_vm1, %v2033_v10 }
 0x3be   :  { %v815_v13 = vmul.f32 %v2024_v12, %v2229_v43  ;;  %1950 = vmatprep.subr.bf16.mxu0 %v1986_v21  ;;  %v1556_v12 = vsub.s32 4, %v2098_v5 }
 0x3c0   :  { %1946 = vmatmul.mubr.msk.f32.vlgmr.msra.gmra.mxu1 %vm113_vm2, %v815_v13  ;;  %1951 = vmatpush3.bf16.msra.mxu0 %v1986_v21  ;;  %v1562_v13 = vsub.s32 5, %v2098_v5 }
 0x3c1   :  { %1962 = vmatprep.subr.bf16.mxu0 %v1989_v63 }
 0x41b   :  { %v964_v14 = vpop.f32.mrf.mxu1 }
 0x41d   :  { %v1917_v15 = vpop.f32.mrf.mxu1 }
 0x41f   :  { %v888_v16 = vpop.f32.mrf.mxu0 }
 0x421   :  { %v1912_v17 = vpop.f32.mrf.mxu0 }
 0x422   :  { %v1563_v17 = vrot.slane %v2104_v7, %v1562_v13 }
 0x473   :  { %v1040_v10 = vpop.f32.mrf.mxu0 }
 0x474   :  { %1426 = vrot.lane.b32.xlu0 %v1040_v10, %s2040_s13 }
 0x475   :  { %v1922_v22 = vpop.f32.mrf.mxu0 }
 0x477   :  { %v1192_v23 = vpop.f32.mrf.mxu0 }
 0x478   :  { %v1116_v24 = vpop.f32.mrf.mxu1  ;;  %1434 = vrot.lane.b32.xlu0 %v1192_v23, %s2041_s14 }
 0x479   :  { %1428 = vrot.lane.b32.xlu1 %v1116_v24, %s2040_s13  ;;  %v1932_v25 = vpop.f32.mrf.mxu0 }
 0x47a   :  { %v1927_v26 = vpop.f32.mrf.mxu1  ;;  %v1991_v25 = vld [vmem:[%s2332_s4 + $0x8] sm:$0xff]  }
 0x47b   :  { %v1344_v27 = vpop.f32.mrf.mxu0  ;;  %v1992_v26 = vld [vmem:[%s2332_s4] sm:$0xff]  }
 0x47c   :  { %v1268_v28 = vpop.f32.mrf.mxu1  ;;  %1442 = vrot.lane.b32.xlu0 %v1344_v27, %s2042_s15  ;;  %v1572_v27 = vsub.s32 2, %v2098_v5 }
 0x47d   :  { %1436 = vrot.lane.b32.xlu1 %v1268_v28, %s2041_s14  ;;  %v1942_v29 = vpop.f32.mrf.mxu0 }
 0x47e   :  { %v1937_v30 = vpop.f32.mrf.mxu1  ;;  %v1573_v28 = vrot.slane %v2104_v7, %v1572_v27 }
 0x480   :  { %v1420_v31 = vpop.f32.mrf.mxu1 }
 0x481   :  { %1444 = vrot.lane.b32.xlu1 %v1420_v31, %s2042_s15 }
 0x482   :  { %v1947_v32 = vpop.f32.mrf.mxu1 }
 0x4e6   :  { %v1427_v33 = vpop.permute.xlu0 %1426 }
 0x4e7   :  { %v1448_v36 = vsel %vm113_vm2, %v888_v16, %v1427_v33 }
 0x4ea   :  { %v1435_v34 = vpop.permute.xlu0 %1434 }
 0x4eb   :  { %v1429_v35 = vpop.permute.xlu1 %1428  ;;  %v1451_v37 = vsel %vm1450_vm3, %v1448_v36, %v1435_v34 }
 0x4ec   :  { %v1449_v41 = vsel %vm113_vm2, %v964_v14, %v1429_v35  ;;  %v1557_v14 = vrot.slane %v2104_v7, %v1556_v12  ;;  %v1647_v35 = vsub.s32 3, %v2098_v5 }
 0x4ee   :  { %v1443_v38 = vpop.permute.xlu0 %1442  ;;  %v1648_v36 = vrot.slane %v2104_v7, %v1647_v35 }
 0x4ef   :  { %v1437_v39 = vpop.permute.xlu1 %1436  ;;  %v1454_v40 = vsel %vm1453_vm4, %v1451_v37, %v1443_v38 }
 0x4f0   :  { %1952 = vmatprep.mubr.msk.f32.mxu0 %vm47_vm0, %v1454_v40  ;;  %v1452_v42 = vsel %vm1450_vm3, %v1449_v41, %v1437_v39 }
 0x4f3   :  { %v1445_v43 = vpop.permute.xlu1 %1444 }
 0x4f4   :  { %v1455_v44 = vsel %vm1453_vm4, %v1452_v42, %v1445_v43 }
 0x4f5   :  { %1953 = vmatmul.mubr.msk.f32.vlgmr.msra.gmra.mxu0 %vm47_vm0, %v1455_v44 }
 0x4f6   :  { %1963 = vmatpush3.bf16.msra.mxu0 %v1989_v63 }
 0x4f7   :  { %1964 = vmatprep.subr.bf16.mxu0 %v1990_v0 }
 0x4fa   :  { %1965 = vmatpush3.bf16.msra.mxu0 %v1990_v0 }
 0x4fb   :  { %1966 = vmatprep.subr.bf16.mxu0 %v1991_v25 }
 0x4fe   :  { %1967 = vmatpush3.bf16.msra.mxu0 %v1991_v25 }
 0x4ff   :  { %1968 = vmatprep.subr.bf16.mxu0 %v1992_v26 }
 0x502   :  { %1969 = vmatpush3.bf16.msra.mxu0 %v1992_v26 }
 0x5b5   :  { %v1954_v47 = vpop.f32.mrf.mxu0 }
 0x5b6   :  { %v1522_v48 = vadd.f32 %v1954_v47, %v1463_v46 }
 0x5b7   :  { %v1516_v49 = vpop.f32.mrf.mxu0 }
 0x5b8   :  { %v1517_v50 = vadd.f32 %v1516_v49, %v1463_v46  ;;  %v1526_v51 = vadd.f32 %v1522_v48, %v2094_v3 }
 0x5ba   :  { %v1530_v52 = vsel %vm47_vm0, %v1526_v51, 0.0  ;;  %v1525_v53 = vadd.f32 %v1517_v50, %v2087_v2  ;;  %v1987_v2 = vld [vmem:[%s2331_s3 + $0x8] sm:$0xff]  }
 0x5bb   :  { %1531 = vadd.xlane.f32.xlu1 %v1530_v52  ;;  %1955 = vmatprep.subr.bf16.mxu1 %v1987_v2 }
 0x5bc   :  { %v1527_v18 = vsel %vm47_vm0, %v1525_v53, 0.0  ;;  %1956 = vmatpush3.bf16.msra.mxu1 %v1987_v2 }
 0x5bd   :  { %1528 = vadd.xlane.f32.xlu0 %v1527_v18  ;;  %1957 = vmatprep.subr.bf16.mxu1 %v1988_v62 }
 0x5c0   :  { %1958 = vmatpush3.bf16.msra.mxu1 %v1988_v62 }
 0x644   :  { %v1532_v19 = vpop.xlane.xlu1 %1531 }
 0x645   :  { %v1535_v54 = vmul.f32 0.03125, %v1532_v19 }
 0x646   :  { %v1529_v55 = vpop.xlane.xlu0 %1528 }
 0x647   :  { %v1534_v56 = vmul.f32 0.03125, %v1529_v55  ;;  %v1537_v57 = vsub.f32 %v1526_v51, %v1535_v54 }
 0x649   :  { %v1536_v58 = vsub.f32 %v1525_v53, %v1534_v56  ;;  %v1539_v61 = vmul.f32 %v1537_v57, %v1537_v57 }
 0x64b   :  { %v1538_v59 = vmul.f32 %v1536_v58, %v1536_v58  ;;  %v1543_v3 = vsel %vm47_vm0, %v1539_v61, 0.0 }
 0x64d   :  { %v1540_v60 = vsel %vm47_vm0, %v1538_v59, 0.0  ;;  %v1753_v59 = vsub.s32 6, %v2098_v5 }
 0x64e   :  { %1541 = vadd.xlane.f32.xlu0 %v1540_v60  ;;  %v1759_v60 = vsub.s32 7, %v2098_v5 }
 0x64f   :  { %v1754_v61 = vrot.slane %v2104_v7, %v1753_v59 }
 0x650   :  { %v1760_v2 = vrot.slane %v2104_v7, %v1759_v60 }
 0x652   :  { %1544 = vadd.xlane.f32.xlu0 %v1543_v3 }
 0x6d7   :  { %v1542_v1 = vpop.xlane.xlu0 %1541 }
 0x6d8   :  { %v1546_v4 = vmul.f32 0.03125, %v1542_v1 }
 0x6da   :  { %v1548_v6 = vadd.f32 1e-05, %v1546_v4 }
 0x6db   :  { %v1545_v8 = vpop.xlane.xlu0 %1544 }
 0x6dc   :  { %2025 = vrsqrt.f32 %v1548_v6  ;;  %v1547_v9 = vmul.f32 0.03125, %v1545_v8 }
 0x6de   :  { %v1549_v11 = vadd.f32 1e-05, %v1547_v9 }
 0x6e0   :  { %2027 = vrsqrt.f32 %v1549_v11 }
 0x6e9   :  { %v2026_v15 = vpop.eup %2025 }
 0x6ea   :  { %v1552_v16 = vmul.f32 %v2026_v15, %v1536_v58 }
 0x6ec   :  { %v1558_v20 = vmul.f32 %v1557_v14, %v1552_v16 }
 0x6ed   :  { %v2028_v21 = vpop.eup %2027 }
 0x6ee   :  { %v1553_v10 = vmul.f32 %v2028_v21, %v1537_v57  ;;  %v1564_v22 = vadd.f32 %v1563_v17, %v1558_v20 }
 0x6f0   :  { %v1559_v23 = vmul.f32 %v1557_v14, %v1553_v10  ;;  %1959 = vmatprep.mubr.msk.f32.mxu1 %vm47_vm0, %v1564_v22 }
 0x6f2   :  { %v1565_v24 = vadd.f32 %v1563_v17, %v1559_v23 }
 0x6f4   :  { %1960 = vmatmul.mubr.msk.f32.vlgmr.msra.gmra.mxu1 %vm47_vm0, %v1565_v24 }
 0x7b4   :  { %v1961_v29 = vpop.f32.mrf.mxu1 }
 0x7b5   :  { %v1632_v30 = vadd.f32 %v1961_v29, %v1573_v28 }
 0x7b6   :  { %v1626_v31 = vpop.f32.mrf.mxu1 }
 0x7b7   :  { %v1627_v32 = vadd.f32 %v1626_v31, %v1573_v28  ;;  %v1636_v34 = vmax.f32 %v1632_v30, 0.0 }
 0x7b9   :  { %v1635_v33 = vmax.f32 %v1627_v32, 0.0 }
 0x7bb   :  { %1970 = vmatprep.mubr.msk.f32.mxu0 %vm1673_vm5, %v1635_v33 }
 0x7bc   :  { %1971 = vmatmul.mubr.msk.f32.vlgmr.msra.gmra.mxu0 %vm1673_vm5, %v1636_v34 }
 0x87c   :  { %v1972_v37 = vpop.f32.mrf.mxu0 }
 0x87d   :  { %v1720_v38 = vadd.f32 %v1972_v37, %v1648_v36 }
 0x87e   :  { %v1714_v39 = vpop.f32.mrf.mxu0 }
 0x87f   :  { %v1715_v40 = vadd.f32 %v1714_v39, %v1648_v36  ;;  %v1724_v41 = vadd.f32 %v1720_v38, %v1565_v24 }
 0x881   :  { %v1728_v42 = vsel %vm47_vm0, %v1724_v41, 0.0  ;;  %v1723_v43 = vadd.f32 %v1715_v40, %v1564_v22 }
 0x882   :  { %1729 = vadd.xlane.f32.xlu0 %v1728_v42 }
 0x883   :  { %v1725_v44 = vsel %vm47_vm0, %v1723_v43, 0.0 }
 0x884   :  { %1726 = vadd.xlane.f32.xlu1 %v1725_v44 }
 0x90b   :  { %v1730_v45 = vpop.xlane.xlu0 %1729 }
 0x90c   :  { %v1732_v46 = vmul.f32 0.03125, %v1730_v45 }
 0x90d   :  { %v1727_v47 = vpop.xlane.xlu1 %1726 }
 0x90e   :  { %v1734_v48 = vsub.f32 %v1724_v41, %v1732_v46  ;;  %v1731_v49 = vmul.f32 0.03125, %v1727_v47 }
 0x910   :  { %v1733_v50 = vsub.f32 %v1723_v43, %v1731_v49  ;;  %v1736_v51 = vmul.f32 %v1734_v48, %v1734_v48 }
 0x912   :  { %v1740_v52 = vsel %vm47_vm0, %v1736_v51, 0.0  ;;  %v1735_v53 = vmul.f32 %v1733_v50, %v1733_v50 }
 0x913   :  { %1741 = vadd.xlane.f32.xlu0 %v1740_v52 }
 0x914   :  { %v1737_v18 = vsel %vm47_vm0, %v1735_v53, 0.0 }
 0x915   :  { %1738 = vadd.xlane.f32.xlu1 %v1737_v18 }
 0x99c   :  { %v1742_v19 = vpop.xlane.xlu0 %1741 }
 0x99d   :  { %v1744_v54 = vmul.f32 0.03125, %v1742_v19 }
 0x99e   :  { %v1739_v55 = vpop.xlane.xlu1 %1738 }
 0x99f   :  { %v1746_v56 = vadd.f32 1e-05, %v1744_v54  ;;  %v1743_v57 = vmul.f32 0.03125, %v1739_v55 }
 0x9a1   :  { %2029 = vrsqrt.f32 %v1746_v56  ;;  %v1745_v58 = vadd.f32 1e-05, %v1743_v57 }
 0x9a3   :  { %2031 = vrsqrt.f32 %v1745_v58 }
 0x9ae   :  { %v2030_v3 = vpop.eup %2029 }
 0x9af   :  { %v1750_v62 = vmul.f32 %v2030_v3, %v1734_v48 }
 0x9b0   :  { %v2032_v63 = vpop.eup %2031 }
 0x9b1   :  { %v1756_v0 = vmul.f32 %v1754_v61, %v1750_v62  ;;  %v1749_v1 = vmul.f32 %v2032_v63, %v1733_v50 }
 0x9b3   :  { %v1762_v4 = vadd.f32 %v1760_v2, %v1756_v0  ;;  %v1755_v6 = vmul.f32 %v1754_v61, %v1749_v1 }
 0x9b5   :  { %1764 = vst.msk [vmem:[%s2333_s6 + $0x8] sm:$0xff] %vm47_vm0, %v1762_v4  ;;  %v1761_v8 = vadd.f32 %v1760_v2, %v1755_v6 }
 0x9b7   :  { %1763 = vst.msk [vmem:[%s2333_s6] sm:$0xff] %vm47_vm0, %v1761_v8 }

</bundles_post_ra>
